<compile_context>
chip_gen: v7x
topology: tpu7x:2x2x1
jax: 0.10.0
libtpu: 0.0.40
codegen_flags: <defaults>
</compile_context>

<pallas_src>
import functools
import math

import jax
import jax.numpy as jnp
from jax.experimental import pallas as pl
from jax.experimental.pallas import tpu as pltpu

LANE = 128      # lane width (last dim)
SUBLANE = 8     # f32 sublane granularity (second-to-last dim)


def _ceil_to(n, m):
    return ((n + m - 1) // m) * m


def _vmem_capacity_bytes():
    """Generation-aware VMEM capacity (v5e/v6e: 128 MiB, v7x: 64 MiB)."""
    try:
        info = pltpu.get_tpu_info()
        for attr in ("vmem_capacity_bytes", "vmem_bytes", "vmem_size_bytes"):
            v = getattr(info, attr, None)
            if v:
                return int(v)
    except Exception:
        pass
    return 64 << 20  # conservative fallback = smallest (v7x per-TC) VMEM


def _pick_tm(batch):
    """Batch tile: sublane-aligned, <=256 rows, and (when possible) >=2 grid
    iterations so the 'parallel' batch axis can be split across v7x's two
    TensorCores.  The extra grid step is ~0.35us on single-TC v5e/v6e."""
    if batch <= SUBLANE:
        return batch                                   # full-dim block, always legal
    half = _ceil_to(pl.cdiv(batch, 2), SUBLANE)
    return min(half, 256)


# ---------------------------------------------------------------------------
# Fused whole-MLP kernel: activations never leave VMEM/vregs between layers.
# ---------------------------------------------------------------------------
def _fused_mlp_kernel(x_ref, *refs):
    """refs = (w0, b0, w1, b1, ..., wL, bL, o_ref)."""
    *wb_refs, o_ref = refs
    n_layers = len(wb_refs) // 2

    h = x_ref[...]
    for li in range(n_layers):
        w = wb_refs[2 * li][...]
        b = wb_refs[2 * li + 1][...]            # [1, Dout], f32, broadcasts over batch
        # bf16 (or f32) matmul inputs, f32 accumulation on the MXU.
        y = jnp.dot(h.astype(w.dtype), w, preferred_element_type=jnp.float32)
        y = y + b.astype(jnp.float32)
        if li < n_layers - 1:                    # ReLU on every layer except classifier
            y = jnp.maximum(y, 0.0)
        h = y
    o_ref[...] = h.astype(o_ref.dtype)


def fused_mlp_forward(x, padded_layers, num_labels, *, vmem_budget):
    """x: [B, Din] (unpadded).  padded_layers: list of (W, b) with hidden dims
    zero-padded to multiples of 128; layer-0 K and classifier N left unpadded."""
    B, Din = x.shape
    out_dim = padded_layers[-1][0].shape[1]
    assert out_dim == num_labels

    tm = _pick_tm(B)
    grid = (pl.cdiv(B, tm),)

    operands = [x]
    for w_p, b_p in padded_layers:
        operands += [w_p, b_p]

    def build_specs(single_buffer):
        specs = [pl.BlockSpec((tm, Din), lambda i: (i, 0))]
        for w_p, b_p in padded_layers:
            if single_buffer:
                # Grid-invariant blocks: DMA'd once, single-buffered -> halves
                # resident-weight VMEM vs. the default double buffering.
                specs.append(pl.BlockSpec(w_p.shape, lambda i: (0, 0),
                                          pipeline_mode=pl.Buffered(1)))
                specs.append(pl.BlockSpec(b_p.shape, lambda i: (0, 0),
                                          pipeline_mode=pl.Buffered(1)))
            else:
                specs.append(pl.BlockSpec(w_p.shape, lambda i: (0, 0)))
                specs.append(pl.BlockSpec(b_p.shape, lambda i: (0, 0)))
        return specs

    # VMEM request: (worst-case double-buffered) weights + x/out tiles +
    # in-flight f32 activations, with headroom, capped at the generation-aware
    # budget (never the full physical VMEM).
    w_bytes = sum(int(a.size) * a.dtype.itemsize
                  for wb in padded_layers for a in wb)
    max_width = max(w.shape[1] for w, _ in padded_layers)
    act_bytes = 2 * tm * (Din + out_dim) * x.dtype.itemsize
    inter_bytes = 4 * tm * max_width * 4
    needed = 2 * w_bytes + act_bytes + inter_bytes + (8 << 20)
    vmem_limit = int(min(vmem_budget, needed))

    out_shape = jax.ShapeDtypeStruct((B, out_dim), x.dtype)
    out_spec = pl.BlockSpec((tm, out_dim), lambda i: (i, 0))

    def run(single_buffer):
        return pl.pallas_call(
            _fused_mlp_kernel,
            out_shape=out_shape,
            grid=grid,
            in_specs=build_specs(single_buffer),
            out_specs=out_spec,
            compiler_params=pltpu.CompilerParams(
                dimension_semantics=("parallel",),   # batch tiles -> both v7x TCs
                vmem_limit_bytes=vmem_limit),
        )(*operands)

    if hasattr(pl, "Buffered"):
        try:
            return run(True)
        except Exception:
            pass                                     # fall back to default buffering
    return run(False)


# ---------------------------------------------------------------------------
# Tiled per-layer fallback (for weights too large to stay resident in VMEM).
# ---------------------------------------------------------------------------
def _tiled_linear_kernel(x_ref, w_ref, b_ref, o_ref, acc_ref, *, relu):
    k = pl.program_id(2)

    @pl.when(k == 0)
    def _init():
        acc_ref[...] = jnp.zeros_like(acc_ref)

    acc_ref[...] += jnp.dot(x_ref[...].astype(w_ref.dtype), w_ref[...],
                            preferred_element_type=jnp.float32)

    @pl.when(k == pl.num_programs(2) - 1)
    def _finish():
        y = acc_ref[...] + b_ref[...].astype(jnp.float32)
        if relu:
            y = jnp.maximum(y, 0.0)
        o_ref[...] = y.astype(o_ref.dtype)


def tiled_linear(x, w, b, *, relu, out_dtype, vmem_budget):
    B, K = x.shape
    _, N = w.shape
    # Zero-pad the contraction dim so every K block is exact (no garbage mixing).
    K_p = _ceil_to(K, LANE)
    if K_p != K:
        x = jnp.pad(x, ((0, 0), (0, K_p - K)))
        w = jnp.pad(w, ((0, K_p - K), (0, 0)))
    tk = next(t for t in (512, 256, 128) if K_p % t == 0)
    tm = B if B <= 256 else 256
    tn = N if N <= 256 else 256
    grid = (pl.cdiv(B, tm), pl.cdiv(N, tn), K_p // tk)

    needed = (2 * (tm * tk + tk * tn + tn) + tm * tn) * 4 + (8 << 20)
    vmem_limit = int(min(vmem_budget, needed))

    return pl.pallas_call(
        functools.partial(_tiled_linear_kernel, relu=relu),
        out_shape=jax.ShapeDtypeStruct((B, N), out_dtype),
        grid=grid,
        in_specs=[pl.BlockSpec((tm, tk), lambda i, j, k: (i, k)),
                  pl.BlockSpec((tk, tn), lambda i, j, k: (k, j)),
                  pl.BlockSpec((1, tn), lambda i, j, k: (0, j))],
        out_specs=pl.BlockSpec((tm, tn), lambda i, j, k: (i, j)),
        scratch_shapes=[pltpu.VMEM((tm, tn), jnp.float32)],
        compiler_params=pltpu.CompilerParams(
            dimension_semantics=("parallel", "parallel", "arbitrary"),
            vmem_limit_bytes=vmem_limit),
    )(x, w, b)


def tiled_mlp_forward(x, cd_layers, num_labels, *, compute_dtype, vmem_budget):
    in_dtype = x.dtype
    h = x
    n = len(cd_layers)
    for li, (w, b) in enumerate(cd_layers):
        last = li == n - 1
        h = tiled_linear(h, w, b, relu=not last,
                         out_dtype=in_dtype if last else compute_dtype,
                         vmem_budget=vmem_budget)
    return h


# ---------------------------------------------------------------------------
# Module wrapper
# ---------------------------------------------------------------------------
def _torch_linear_init(key, in_features, out_features, dtype=jnp.float32):
    """nn.Linear default init (uniform +-1/sqrt(fan_in)); stored as [in, out]."""
    kw, kb = jax.random.split(key)
    bound = 1.0 / math.sqrt(in_features)
    w = jax.random.uniform(kw, (in_features, out_features), dtype,
                           minval=-bound, maxval=bound)
    b = jax.random.uniform(kb, (out_features,), dtype, minval=-bound, maxval=bound)
    return w, b


class ClassifierPallas:
    """Pallas port of `Classifier`.  Default compute_dtype=bfloat16 (bf16 weights
    and matmul inputs, f32 accumulation) for MXU throughput on v5e/v6e/v7x;
    compute_dtype=float32 gives a bit-close match to the PyTorch module."""

    def __init__(self, input_dim, hidden_dim, num_labels, dropout_rate=0.1,
                 extra_layers=0, key=None, compute_dtype=jnp.bfloat16):
        if key is None:
            key = jax.random.PRNGKey(0)
        keys = jax.random.split(key, 2 + extra_layers)

        layers = [_torch_linear_init(keys[0], input_dim, hidden_dim)]
        for i in range(extra_layers):
            layers.append(_torch_linear_init(keys[1 + i], hidden_dim, hidden_dim))
        layers.append(_torch_linear_init(keys[1 + extra_layers], hidden_dim, num_labels))

        self.layers = layers                 # f32 master weights (reference / export)
        self.num_labels = num_labels
        self.dropout_rate = dropout_rate     # inference: identity
        self.compute_dtype = compute_dtype

        # Fused-path copies: hidden dims zero-padded to multiples of 128 (exact:
        # padded bias entries and padded W columns are 0, so padded activation
        # columns stay 0 through the ReLU chain).  Layer-0 K is left at the raw
        # input_dim (x is read unpadded) and the classifier N at num_labels
        # (kernel writes the final output directly, no post-slice).
        h_p = _ceil_to(hidden_dim, LANE)
        n_layers = len(layers)
        padded = []
        for li, (w, b) in enumerate(layers):
            last = li == n_layers - 1
            din, dout = w.shape
            din_p = din if li == 0 else h_p
            dout_p = dout if last else h_p
            w_p = jnp.zeros((din_p, dout_p), compute_dtype)
            w_p = w_p.at[:din, :dout].set(w.astype(compute_dtype))
            b_p = jnp.zeros((1, dout_p), jnp.float32)
            b_p = b_p.at[0, :dout].set(b)            # biases kept in f32 (tiny)
            padded.append((w_p, b_p))
        self.padded_layers = padded

        # Unpadded compute_dtype copies for the tiled fallback path.
        self.cd_layers = [(w.astype(compute_dtype),
                           b.astype(jnp.float32).reshape(1, -1)) for w, b in layers]

    def __call__(self, x, *, force_tiled=False):
        # Dropout is identity in eval/inference.
        # TODO(synk): training-mode dropout (pltpu.prng_random_bits mask) not implemented.
        vmem_budget = int(_vmem_capacity_bytes() * 0.8)   # headroom for Mosaic scratch

        w_bytes = sum(int(a.size) * a.dtype.itemsize
                      for wb in self.padded_layers for a in wb)
        tm = _pick_tm(x.shape[0])
        max_width = max(w.shape[1] for w, _ in self.padded_layers)
        est = (2 * w_bytes + 4 * tm * max_width * 4
               + 2 * tm * (x.shape[1] + self.num_labels) * x.dtype.itemsize
               + (4 << 20))

        if force_tiled or est > vmem_budget:
            # TODO(synk): a single layer whose tiles alone exceed VMEM would need a
            # further K-split across multiple pallas_calls; not needed at these sizes.
            return tiled_mlp_forward(x, self.cd_layers, self.num_labels,
                                     compute_dtype=self.compute_dtype,
                                     vmem_budget=vmem_budget)
        return fused_mlp_forward(x, self.padded_layers, self.num_labels,
                                 vmem_budget=vmem_budget)


if __name__ == "__main__":
    key = jax.random.PRNGKey(0)
    k_in, k_params = jax.random.split(key)

    batch, input_dim, hidden_dim, num_labels, extra_layers = 8, 32, 32, 8, 2
    x = jax.random.normal(k_in, (batch, input_dim), dtype=jnp.float32)

    def reference(x, layers, cast_dtype):
        h = x
        n = len(layers)
        for li, (w, b) in enumerate(layers):
            h = jnp.dot(h.astype(cast_dtype), w.astype(cast_dtype),
                        preferred_element_type=jnp.float32) + b
            if li < n - 1:
                h = jnp.maximum(h, 0.0)
        return h

    # Default path: bf16 weights / matmul inputs, f32 accumulation (fused kernel).
    model = ClassifierPallas(input_dim, hidden_dim, num_labels,
                             dropout_rate=0.1, extra_layers=extra_layers,
                             key=k_params)
    out = jax.block_until_ready(model(x))
    ref_bf16 = reference(x, model.layers, jnp.bfloat16)
    assert out.shape == (batch, num_labels)
    assert jnp.allclose(out, ref_bf16, atol=1e-2, rtol=1e-2)

    # Tiled fallback path exercised explicitly at small shapes.
    out_tiled = jax.block_until_ready(model(x, force_tiled=True))
    assert out_tiled.shape == (batch, num_labels)
    assert jnp.allclose(out_tiled, ref_bf16, atol=1e-2, rtol=1e-2)

    # f32 opt-in path: bit-close to the PyTorch-module math.
    model_f32 = ClassifierPallas(input_dim, hidden_dim, num_labels,
                                 dropout_rate=0.1, extra_layers=extra_layers,
                                 key=k_params, compute_dtype=jnp.float32)
    out_f32 = jax.block_until_ready(model_f32(x))
    ref_f32 = reference(x, model_f32.layers, jnp.float32)
    assert jnp.allclose(out_f32, ref_f32, atol=1e-4, rtol=1e-4)

    print("KERNEL_OK")
</pallas_src>

<mosaic_0001>
module attributes {stable_mosaic.version = 11 : i64} {
  func.func @_fused_mlp_kernel(%arg0: i32, %arg1: memref<8x32xf32, #tpu.memory_space<vmem>>, %arg2: memref<32x128xbf16, #tpu.memory_space<vmem>>, %arg3: memref<1x128xf32, #tpu.memory_space<vmem>>, %arg4: memref<128x128xbf16, #tpu.memory_space<vmem>>, %arg5: memref<1x128xf32, #tpu.memory_space<vmem>>, %arg6: memref<128x128xbf16, #tpu.memory_space<vmem>>, %arg7: memref<1x128xf32, #tpu.memory_space<vmem>>, %arg8: memref<128x8xbf16, #tpu.memory_space<vmem>>, %arg9: memref<1x8xf32, #tpu.memory_space<vmem>>, %arg10: memref<8x8xf32, #tpu.memory_space<vmem>>) attributes {dimension_semantics = [#tpu.dimension_semantics<parallel>], iteration_bounds = array<i64: 1>, scalar_prefetch = 0 : i64, scratch_operands = 0 : i64, tpu.core_type = #tpu.core_type<tc>, window_params = [{transform_indices = @transform_0, window_bounds = array<i64: 8, 32>}, {pipeline_mode = #tpu.pipeline_mode<synchronous>, transform_indices = @transform_1, window_bounds = array<i64: 32, 128>}, {pipeline_mode = #tpu.pipeline_mode<synchronous>, transform_indices = @transform_2, window_bounds = array<i64: 1, 128>}, {pipeline_mode = #tpu.pipeline_mode<synchronous>, transform_indices = @transform_3, window_bounds = array<i64: 128, 128>}, {pipeline_mode = #tpu.pipeline_mode<synchronous>, transform_indices = @transform_4, window_bounds = array<i64: 1, 128>}, {pipeline_mode = #tpu.pipeline_mode<synchronous>, transform_indices = @transform_5, window_bounds = array<i64: 128, 128>}, {pipeline_mode = #tpu.pipeline_mode<synchronous>, transform_indices = @transform_6, window_bounds = array<i64: 1, 128>}, {pipeline_mode = #tpu.pipeline_mode<synchronous>, transform_indices = @transform_7, window_bounds = array<i64: 128, 8>}, {pipeline_mode = #tpu.pipeline_mode<synchronous>, transform_indices = @transform_8, window_bounds = array<i64: 1, 8>}, {transform_indices = @transform_9, window_bounds = array<i64: 8, 8>}]} {
    %c0 = arith.constant 0 : index
    %c0_0 = arith.constant 0 : index
    %0 = vector.load %arg1[%c0, %c0_0] : memref<8x32xf32, #tpu.memory_space<vmem>>, vector<8x32xf32>
    %c0_1 = arith.constant 0 : index
    %c0_2 = arith.constant 0 : index
    %1 = vector.load %arg2[%c0_1, %c0_2] : memref<32x128xbf16, #tpu.memory_space<vmem>>, vector<32x128xbf16>
    %c0_3 = arith.constant 0 : index
    %c0_4 = arith.constant 0 : index
    %2 = vector.load %arg3[%c0_3, %c0_4] : memref<1x128xf32, #tpu.memory_space<vmem>>, vector<1x128xf32>
    %3 = arith.truncf %0 : vector<8x32xf32> to vector<8x32xbf16>
    %cst = arith.constant dense<0.000000e+00> : vector<8x128xf32>
    %4 = tpu.matmul %3, %1, %cst {dimension_numbers = #tpu.dot_dimension_numbers<[1], [0], [0], [1], [0, 0, 1, 1], [], []>} : vector<8x32xbf16>, vector<32x128xbf16>, vector<8x128xf32> -> vector<8x128xf32>
    %5 = vector.broadcast %2 : vector<1x128xf32> to vector<8x128xf32>
    %6 = arith.addf %4, %5 : vector<8x128xf32>
    %cst_5 = arith.constant 0.000000e+00 : f32
    %7 = vector.broadcast %cst_5 : f32 to vector<8x128xf32>
    %8 = arith.maximumf %6, %7 : vector<8x128xf32>
    %c0_6 = arith.constant 0 : index
    %c0_7 = arith.constant 0 : index
    %9 = vector.load %arg4[%c0_6, %c0_7] : memref<128x128xbf16, #tpu.memory_space<vmem>>, vector<128x128xbf16>
    %c0_8 = arith.constant 0 : index
    %c0_9 = arith.constant 0 : index
    %10 = vector.load %arg5[%c0_8, %c0_9] : memref<1x128xf32, #tpu.memory_space<vmem>>, vector<1x128xf32>
    %11 = arith.truncf %8 : vector<8x128xf32> to vector<8x128xbf16>
    %cst_10 = arith.constant dense<0.000000e+00> : vector<8x128xf32>
    %12 = tpu.matmul %11, %9, %cst_10 {dimension_numbers = #tpu.dot_dimension_numbers<[1], [0], [0], [1], [0, 0, 1, 1], [], []>} : vector<8x128xbf16>, vector<128x128xbf16>, vector<8x128xf32> -> vector<8x128xf32>
    %13 = vector.broadcast %10 : vector<1x128xf32> to vector<8x128xf32>
    %14 = arith.addf %12, %13 : vector<8x128xf32>
    %cst_11 = arith.constant 0.000000e+00 : f32
    %15 = vector.broadcast %cst_11 : f32 to vector<8x128xf32>
    %16 = arith.maximumf %14, %15 : vector<8x128xf32>
    %c0_12 = arith.constant 0 : index
    %c0_13 = arith.constant 0 : index
    %17 = vector.load %arg6[%c0_12, %c0_13] : memref<128x128xbf16, #tpu.memory_space<vmem>>, vector<128x128xbf16>
    %c0_14 = arith.constant 0 : index
    %c0_15 = arith.constant 0 : index
    %18 = vector.load %arg7[%c0_14, %c0_15] : memref<1x128xf32, #tpu.memory_space<vmem>>, vector<1x128xf32>
    %19 = arith.truncf %16 : vector<8x128xf32> to vector<8x128xbf16>
    %cst_16 = arith.constant dense<0.000000e+00> : vector<8x128xf32>
    %20 = tpu.matmul %19, %17, %cst_16 {dimension_numbers = #tpu.dot_dimension_numbers<[1], [0], [0], [1], [0, 0, 1, 1], [], []>} : vector<8x128xbf16>, vector<128x128xbf16>, vector<8x128xf32> -> vector<8x128xf32>
    %21 = vector.broadcast %18 : vector<1x128xf32> to vector<8x128xf32>
    %22 = arith.addf %20, %21 : vector<8x128xf32>
    %cst_17 = arith.constant 0.000000e+00 : f32
    %23 = vector.broadcast %cst_17 : f32 to vector<8x128xf32>
    %24 = arith.maximumf %22, %23 : vector<8x128xf32>
    %c0_18 = arith.constant 0 : index
    %c0_19 = arith.constant 0 : index
    %25 = vector.load %arg8[%c0_18, %c0_19] : memref<128x8xbf16, #tpu.memory_space<vmem>>, vector<128x8xbf16>
    %c0_20 = arith.constant 0 : index
    %c0_21 = arith.constant 0 : index
    %26 = vector.load %arg9[%c0_20, %c0_21] : memref<1x8xf32, #tpu.memory_space<vmem>>, vector<1x8xf32>
    %27 = arith.truncf %24 : vector<8x128xf32> to vector<8x128xbf16>
    %cst_22 = arith.constant dense<0.000000e+00> : vector<8x8xf32>
    %28 = tpu.matmul %27, %25, %cst_22 {dimension_numbers = #tpu.dot_dimension_numbers<[1], [0], [0], [1], [0, 0, 1, 1], [], []>} : vector<8x128xbf16>, vector<128x8xbf16>, vector<8x8xf32> -> vector<8x8xf32>
    %29 = vector.broadcast %26 : vector<1x8xf32> to vector<8x8xf32>
    %30 = arith.addf %28, %29 : vector<8x8xf32>
    %c0_23 = arith.constant 0 : index
    %c0_24 = arith.constant 0 : index
    %31 = vector.load %arg10[%c0_23, %c0_24] : memref<8x8xf32, #tpu.memory_space<vmem>>, vector<8x8xf32>
    tpu.vector_store %arg10[%c0_23, %c0_24], %30 {strides = array<i32>} : memref<8x8xf32, #tpu.memory_space<vmem>>, vector<8x8xf32>,
    return
  }
  func.func @transform_0(%arg0: i32) -> (i32, i32) {
    %c0_i32 = arith.constant 0 : i32
    %c0_i32_0 = arith.constant 0 : i32
    return %arg0, %c0_i32 : i32, i32
  }
  func.func @transform_1(%arg0: i32) -> (i32, i32) {
    %c0_i32 = arith.constant 0 : i32
    %c0_i32_0 = arith.constant 0 : i32
    %c0_i32_1 = arith.constant 0 : i32
    return %c0_i32, %c0_i32_0 : i32, i32
  }
  func.func @transform_2(%arg0: i32) -> (i32, i32) {
    %c0_i32 = arith.constant 0 : i32
    %c0_i32_0 = arith.constant 0 : i32
    %c0_i32_1 = arith.constant 0 : i32
    return %c0_i32, %c0_i32_0 : i32, i32
  }
  func.func @transform_3(%arg0: i32) -> (i32, i32) {
    %c0_i32 = arith.constant 0 : i32
    %c0_i32_0 = arith.constant 0 : i32
    %c0_i32_1 = arith.constant 0 : i32
    return %c0_i32, %c0_i32_0 : i32, i32
  }
  func.func @transform_4(%arg0: i32) -> (i32, i32) {
    %c0_i32 = arith.constant 0 : i32
    %c0_i32_0 = arith.constant 0 : i32
    %c0_i32_1 = arith.constant 0 : i32
    return %c0_i32, %c0_i32_0 : i32, i32
  }
  func.func @transform_5(%arg0: i32) -> (i32, i32) {
    %c0_i32 = arith.constant 0 : i32
    %c0_i32_0 = arith.constant 0 : i32
    %c0_i32_1 = arith.constant 0 : i32
    return %c0_i32, %c0_i32_0 : i32, i32
  }
  func.func @transform_6(%arg0: i32) -> (i32, i32) {
    %c0_i32 = arith.constant 0 : i32
    %c0_i32_0 = arith.constant 0 : i32
    %c0_i32_1 = arith.constant 0 : i32
    return %c0_i32, %c0_i32_0 : i32, i32
  }
  func.func @transform_7(%arg0: i32) -> (i32, i32) {
    %c0_i32 = arith.constant 0 : i32
    %c0_i32_0 = arith.constant 0 : i32
    %c0_i32_1 = arith.constant 0 : i32
    return %c0_i32, %c0_i32_0 : i32, i32
  }
  func.func @transform_8(%arg0: i32) -> (i32, i32) {
    %c0_i32 = arith.constant 0 : i32
    %c0_i32_0 = arith.constant 0 : i32
    %c0_i32_1 = arith.constant 0 : i32
    return %c0_i32, %c0_i32_0 : i32, i32
  }
  func.func @transform_9(%arg0: i32) -> (i32, i32) {
    %c0_i32 = arith.constant 0 : i32
    %c0_i32_0 = arith.constant 0 : i32
    return %arg0, %c0_i32 : i32, i32
  }
}

module attributes {stable_mosaic.version = 11 : i64} {
  func.func @_fused_mlp_kernel(%arg0: i32, %arg1: memref<8x32xf32, #tpu.memory_space<vmem>>, %arg2: memref<32x128xbf16, #tpu.memory_space<vmem>>, %arg3: memref<1x128xf32, #tpu.memory_space<vmem>>, %arg4: memref<128x128xbf16, #tpu.memory_space<vmem>>, %arg5: memref<1x128xf32, #tpu.memory_space<vmem>>, %arg6: memref<128x128xbf16, #tpu.memory_space<vmem>>, %arg7: memref<1x128xf32, #tpu.memory_space<vmem>>, %arg8: memref<128x8xbf16, #tpu.memory_space<vmem>>, %arg9: memref<1x8xf32, #tpu.memory_space<vmem>>, %arg10: memref<8x8xf32, #tpu.memory_space<vmem>>) attributes {dimension_semantics = [#tpu.dimension_semantics<parallel>], iteration_bounds = array<i64: 1>, scalar_prefetch = 0 : i64, scratch_operands = 0 : i64, tpu.core_type = #tpu.core_type<tc>, window_params = [{transform_indices = @transform_0, window_bounds = array<i64: 8, 32>}, {pipeline_mode = #tpu.pipeline_mode<synchronous>, transform_indices = @transform_1, window_bounds = array<i64: 32, 128>}, {pipeline_mode = #tpu.pipeline_mode<synchronous>, transform_indices = @transform_2, window_bounds = array<i64: 1, 128>}, {pipeline_mode = #tpu.pipeline_mode<synchronous>, transform_indices = @transform_3, window_bounds = array<i64: 128, 128>}, {pipeline_mode = #tpu.pipeline_mode<synchronous>, transform_indices = @transform_4, window_bounds = array<i64: 1, 128>}, {pipeline_mode = #tpu.pipeline_mode<synchronous>, transform_indices = @transform_5, window_bounds = array<i64: 128, 128>}, {pipeline_mode = #tpu.pipeline_mode<synchronous>, transform_indices = @transform_6, window_bounds = array<i64: 1, 128>}, {pipeline_mode = #tpu.pipeline_mode<synchronous>, transform_indices = @transform_7, window_bounds = array<i64: 128, 8>}, {pipeline_mode = #tpu.pipeline_mode<synchronous>, transform_indices = @transform_8, window_bounds = array<i64: 1, 8>}, {transform_indices = @transform_9, window_bounds = array<i64: 8, 8>}]} {
    %c0 = arith.constant 0 : index
    %c0_0 = arith.constant 0 : index
    %0 = vector.load %arg1[%c0, %c0_0] : memref<8x32xf32, #tpu.memory_space<vmem>>, vector<8x32xf32>
    %c0_1 = arith.constant 0 : index
    %c0_2 = arith.constant 0 : index
    %1 = vector.load %arg2[%c0_1, %c0_2] : memref<32x128xbf16, #tpu.memory_space<vmem>>, vector<32x128xbf16>
    %c0_3 = arith.constant 0 : index
    %c0_4 = arith.constant 0 : index
    %2 = vector.load %arg3[%c0_3, %c0_4] : memref<1x128xf32, #tpu.memory_space<vmem>>, vector<1x128xf32>
    %3 = arith.truncf %0 : vector<8x32xf32> to vector<8x32xbf16>
    %cst = arith.constant dense<0.000000e+00> : vector<8x128xf32>
    %4 = tpu.matmul %3, %1, %cst {dimension_numbers = #tpu.dot_dimension_numbers<[1], [0], [0], [1], [0, 0, 1, 1], [], []>} : vector<8x32xbf16>, vector<32x128xbf16>, vector<8x128xf32> -> vector<8x128xf32>
    %5 = vector.broadcast %2 : vector<1x128xf32> to vector<8x128xf32>
    %6 = arith.addf %4, %5 : vector<8x128xf32>
    %cst_5 = arith.constant 0.000000e+00 : f32
    %7 = vector.broadcast %cst_5 : f32 to vector<8x128xf32>
    %8 = arith.maximumf %6, %7 : vector<8x128xf32>
    %c0_6 = arith.constant 0 : index
    %c0_7 = arith.constant 0 : index
    %9 = vector.load %arg4[%c0_6, %c0_7] : memref<128x128xbf16, #tpu.memory_space<vmem>>, vector<128x128xbf16>
    %c0_8 = arith.constant 0 : index
    %c0_9 = arith.constant 0 : index
    %10 = vector.load %arg5[%c0_8, %c0_9] : memref<1x128xf32, #tpu.memory_space<vmem>>, vector<1x128xf32>
    %11 = arith.truncf %8 : vector<8x128xf32> to vector<8x128xbf16>
    %cst_10 = arith.constant dense<0.000000e+00> : vector<8x128xf32>
    %12 = tpu.matmul %11, %9, %cst_10 {dimension_numbers = #tpu.dot_dimension_numbers<[1], [0], [0], [1], [0, 0, 1, 1], [], []>} : vector<8x128xbf16>, vector<128x128xbf16>, vector<8x128xf32> -> vector<8x128xf32>
    %13 = vector.broadcast %10 : vector<1x128xf32> to vector<8x128xf32>
    %14 = arith.addf %12, %13 : vector<8x128xf32>
    %cst_11 = arith.constant 0.000000e+00 : f32
    %15 = vector.broadcast %cst_11 : f32 to vector<8x128xf32>
    %16 = arith.maximumf %14, %15 : vector<8x128xf32>
    %c0_12 = arith.constant 0 : index
    %c0_13 = arith.constant 0 : index
    %17 = vector.load %arg6[%c0_12, %c0_13] : memref<128x128xbf16, #tpu.memory_space<vmem>>, vector<128x128xbf16>
    %c0_14 = arith.constant 0 : index
    %c0_15 = arith.constant 0 : index
    %18 = vector.load %arg7[%c0_14, %c0_15] : memref<1x128xf32, #tpu.memory_space<vmem>>, vector<1x128xf32>
    %19 = arith.truncf %16 : vector<8x128xf32> to vector<8x128xbf16>
    %cst_16 = arith.constant dense<0.000000e+00> : vector<8x128xf32>
    %20 = tpu.matmul %19, %17, %cst_16 {dimension_numbers = #tpu.dot_dimension_numbers<[1], [0], [0], [1], [0, 0, 1, 1], [], []>} : vector<8x128xbf16>, vector<128x128xbf16>, vector<8x128xf32> -> vector<8x128xf32>
    %21 = vector.broadcast %18 : vector<1x128xf32> to vector<8x128xf32>
    %22 = arith.addf %20, %21 : vector<8x128xf32>
    %cst_17 = arith.constant 0.000000e+00 : f32
    %23 = vector.broadcast %cst_17 : f32 to vector<8x128xf32>
    %24 = arith.maximumf %22, %23 : vector<8x128xf32>
    %c0_18 = arith.constant 0 : index
    %c0_19 = arith.constant 0 : index
    %25 = vector.load %arg8[%c0_18, %c0_19] : memref<128x8xbf16, #tpu.memory_space<vmem>>, vector<128x8xbf16>
    %c0_20 = arith.constant 0 : index
    %c0_21 = arith.constant 0 : index
    %26 = vector.load %arg9[%c0_20, %c0_21] : memref<1x8xf32, #tpu.memory_space<vmem>>, vector<1x8xf32>
    %27 = arith.truncf %24 : vector<8x128xf32> to vector<8x128xbf16>
    %cst_22 = arith.constant dense<0.000000e+00> : vector<8x8xf32>
    %28 = tpu.matmul %27, %25, %cst_22 {dimension_numbers = #tpu.dot_dimension_numbers<[1], [0], [0], [1], [0, 0, 1, 1], [], []>} : vector<8x128xbf16>, vector<128x8xbf16>, vector<8x8xf32> -> vector<8x8xf32>
    %29 = vector.broadcast %26 : vector<1x8xf32> to vector<8x8xf32>
    %30 = arith.addf %28, %29 : vector<8x8xf32>
    %c0_23 = arith.constant 0 : index
    %c0_24 = arith.constant 0 : index
    %31 = vector.load %arg10[%c0_23, %c0_24] : memref<8x8xf32, #tpu.memory_space<vmem>>, vector<8x8xf32>
    tpu.vector_store %arg10[%c0_23, %c0_24], %30 {strides = array<i32>} : memref<8x8xf32, #tpu.memory_space<vmem>>, vector<8x8xf32>,
    return
  }
  func.func @transform_0(%arg0: i32) -> (i32, i32) {
    %c0_i32 = arith.constant 0 : i32
    %c0_i32_0 = arith.constant 0 : i32
    return %arg0, %c0_i32 : i32, i32
  }
  func.func @transform_1(%arg0: i32) -> (i32, i32) {
    %c0_i32 = arith.constant 0 : i32
    %c0_i32_0 = arith.constant 0 : i32
    %c0_i32_1 = arith.constant 0 : i32
    return %c0_i32, %c0_i32_0 : i32, i32
  }
  func.func @transform_2(%arg0: i32) -> (i32, i32) {
    %c0_i32 = arith.constant 0 : i32
    %c0_i32_0 = arith.constant 0 : i32
    %c0_i32_1 = arith.constant 0 : i32
    return %c0_i32, %c0_i32_0 : i32, i32
  }
  func.func @transform_3(%arg0: i32) -> (i32, i32) {
    %c0_i32 = arith.constant 0 : i32
    %c0_i32_0 = arith.constant 0 : i32
    %c0_i32_1 = arith.constant 0 : i32
    return %c0_i32, %c0_i32_0 : i32, i32
  }
  func.func @transform_4(%arg0: i32) -> (i32, i32) {
    %c0_i32 = arith.constant 0 : i32
    %c0_i32_0 = arith.constant 0 : i32
    %c0_i32_1 = arith.constant 0 : i32
    return %c0_i32, %c0_i32_0 : i32, i32
  }
  func.func @transform_5(%arg0: i32) -> (i32, i32) {
    %c0_i32 = arith.constant 0 : i32
    %c0_i32_0 = arith.constant 0 : i32
    %c0_i32_1 = arith.constant 0 : i32
    return %c0_i32, %c0_i32_0 : i32, i32
  }
  func.func @transform_6(%arg0: i32) -> (i32, i32) {
    %c0_i32 = arith.constant 0 : i32
    %c0_i32_0 = arith.constant 0 : i32
    %c0_i32_1 = arith.constant 0 : i32
    return %c0_i32, %c0_i32_0 : i32, i32
  }
  func.func @transform_7(%arg0: i32) -> (i32, i32) {
    %c0_i32 = arith.constant 0 : i32
    %c0_i32_0 = arith.constant 0 : i32
    %c0_i32_1 = arith.constant 0 : i32
    return %c0_i32, %c0_i32_0 : i32, i32
  }
  func.func @transform_8(%arg0: i32) -> (i32, i32) {
    %c0_i32 = arith.constant 0 : i32
    %c0_i32_0 = arith.constant 0 : i32
    %c0_i32_1 = arith.constant 0 : i32
    return %c0_i32, %c0_i32_0 : i32, i32
  }
  func.func @transform_9(%arg0: i32) -> (i32, i32) {
    %c0_i32 = arith.constant 0 : i32
    %c0_i32_0 = arith.constant 0 : i32
    return %arg0, %c0_i32 : i32, i32
  }
}

</mosaic_0001>

<bundles_post_ra>
// kernel: tpu_custom_call.1
= control target key start
LH: loop header
LB: loop body
LE: loop exit
PB: predicated region body
PF: predicated region fallthrough
CT: control target
= control target key end

     0   :  { %14 = vsyncpa [#allocation3], 0  ;;  %s912_s0 = inlined_call_operand.vmem [shape: f32[8,32], index: 0, kind: input, shape index: {}]   ;;  %s913_s1 = inlined_call_operand.hbm [shape: bf16[32,128], index: 1, kind: input, shape index: {}]   ;;  %s914_s2 = inlined_call_operand.vmem [shape: f32[1,128], index: 2, kind: input, shape index: {}]   ;;  %s915_s3 = inlined_call_operand.vmem [shape: bf16[128,128], index: 3, kind: input, shape index: {}]   ;;  %s916_s4 = inlined_call_operand.vmem [shape: f32[1,128], index: 4, kind: input, shape index: {}]   ;;  %s917_s5 = inlined_call_operand.hbm [shape: bf16[128,128], index: 5, kind: input, shape index: {}]   ;;  %s918_s6 = inlined_call_operand.vmem [shape: f32[1,128], index: 6, kind: input, shape index: {}]   ;;  %s919_s7 = inlined_call_operand.vmem [shape: bf16[128,8], index: 7, kind: input, shape index: {}]   ;;  %s920_s8 = inlined_call_operand.vmem [shape: f32[1,8], index: 8, kind: input, shape index: {}]   ;;  %s921_s9 = inlined_call_operand.hbm [shape: f32[8,8], index: 9, kind: output, shape index: {}]  }
   0x1   :  { %15 = vsyncpa [#allocation6], 0 }
   0x2   :  { %16 = vsyncpa [#allocation4], 0  ;;  %s722_s30 = smov [#allocation2]   ;;  %s650_s13 = scalar_lea.hbm %s913_s1, 256 }
   0x3   :  { %s24_s10 = sshll.u32 %s722_s30, 4  ;;  %p651_p0 = scmp.ne.s32.totalorder %s913_s1, %s650_s13  ;;  %s25_s10 = int_to_ptr.vmem [resolvable:$true] %s24_s10 }
   0x4   :  { %p654_p1 = scmp.lt.u32.totalorder %s650_s13, %s913_s1 }
   0x6   :  { %p656_p2 = pnand %p654_p1, %p651_p0 }
   0x8   :  { %659 = shalt.err (!%p656_p2)
}
   0x9   :  { %s660_s18 = scalar_lea.vmem %s25_s10, 256  ;;  %p665_p4 = scmp.lt.s32.totalorder %s25_s10, %s25_s10 }
   0xa   :  { %p661_p3 = scmp.ne.s32.totalorder %s25_s10, %s660_s18  ;;  %p666_p5 = scmp.lt.s32.totalorder %s660_s18, %s660_s18 }
   0xc   :  { %p667_p6 = por %p666_p5, %p665_p4 }
   0xe   :  { %p668_p7 = pnand %p667_p6, %p661_p3 }
  0x10   :  { %671 = shalt.err (!%p668_p7)
}
  0x11   :  { %s723_s19 = smov 64   ;;  %s724_s20 = smov 4  }
  0x12   :  { %30 = dma.hbm_to_vmem [thread:$0]  %s913_s1, 256, %s25_s10, [#allocation3], %s723_s19, %s723_s19, %s724_s20  }
  0x13   :  { %s725_s23 = smov [#allocation5]   ;;  %s672_s27 = scalar_lea.hbm %s917_s5, 1024 }
  0x14   :  { %s42_s24 = sshll.u32 %s725_s23, 4  ;;  %p673_p8 = scmp.ne.s32.totalorder %s917_s5, %s672_s27  ;;  %s43_s24 = int_to_ptr.vmem [resolvable:$true] %s42_s24 }
  0x15   :  { %p676_p9 = scmp.lt.u32.totalorder %s672_s27, %s917_s5 }
  0x17   :  { %p678_p10 = pnand %p676_p9, %p673_p8 }
  0x19   :  { %681 = shalt.err (!%p678_p10)
}
  0x1a   :  { %s682_s12 = scalar_lea.vmem %s43_s24, 1024  ;;  %p687_p12 = scmp.lt.s32.totalorder %s43_s24, %s43_s24 }
  0x1b   :  { %p683_p11 = scmp.ne.s32.totalorder %s43_s24, %s682_s12  ;;  %p688_p13 = scmp.lt.s32.totalorder %s682_s12, %s682_s12 }
  0x1d   :  { %p689_p0 = por %p688_p13, %p687_p12 }
  0x1f   :  { %p690_p1 = pnand %p689_p0, %p683_p11 }
  0x21   :  { %693 = shalt.err (!%p690_p1)
}
  0x22   :  { %48 = dma.hbm_to_vmem [thread:$0]  %s917_s5, 1024, %s43_s24, [#allocation6], %s723_s19, %s723_s19, %s724_s20  }
  0x23   :  { %716 = dma.done.wait [#allocation3], 256  }
  0x24   :  { %717 = vsyncadd [#allocation3], 4294967040 }
  0x25   :  { %718 = dma.done.wait [#allocation6], 1024  }
  0x26   :  { %719 = vsyncadd [#allocation6], 4294966272  ;;  %v726_v0 = vmov 0.0   ;;  %vm727_vm0 = vmmov 0   ;;  %v624_v1 = vld [vmem:[#allocation2] sm:$0xff]   ;;  %v625_v2 = vld [vmem:[#allocation2 + $0x8] sm:$0xff]  }
  0x27   :  { %549 = vmatprep.subr.bf16.mxu0 %v726_v0  ;;  %553 = vmatprep.mubr.msk.bf16.mxu0 %vm727_vm0, %v726_v0  ;;  %v62_v3 = vld [vmem:[%s912_s0] sm:$0xff]  ;;  %v627_v6 = vld [vmem:[%s915_s3 + $0x8] sm:$0xff]   ;;  %vm87_vm1 = vcmask 261120   ;;  %v628_v7 = vld [vmem:[%s915_s3 + $0x10] sm:$0xff]   ;;  %s728_s26 = smov [#allocation7]   ;;  %vm470_vm2 = vcmask 64512  }
  0x28   :  { %557 = vmatprep.subr.bf16.mxu1 %v726_v0  ;;  %573 = vmatprep.mubr.msk.bf16.mxu1 %vm727_vm0, %v726_v0  ;;  %v626_v4 = vld [vmem:[%s915_s3] sm:$0xff]   ;;  %v68_v5 = vpack.c.bf16 %v62_v3, %v62_v3  ;;  %v629_v8 = vld [vmem:[%s915_s3 + $0x18] sm:$0xff]   ;;  %v631_v10 = vld [vmem:[%s915_s3 + $0x28] sm:$0xff]   ;;  %s478_s27 = sshll.u32 %s728_s26, 4  ;;  %s479_s27 = int_to_ptr.vmem [resolvable:$true] %s478_s27 }
  0x29   :  { %550 = vmatpush3.bf16.msra.mxu0 %v624_v1  ;;  %558 = vmatpush3.bf16.msra.mxu1 %v626_v4  ;;  %v630_v9 = vld [vmem:[%s915_s3 + $0x20] sm:$0xff]   ;;  %v632_v11 = vld [vmem:[%s915_s3 + $0x30] sm:$0xff]   ;;  %v633_v12 = vld [vmem:[%s915_s3 + $0x38] sm:$0xff]   ;;  %p699_p3 = scmp.lt.s32.totalorder %s479_s27, %s479_s27 }
  0x2a   :  { %551 = vmatprep.subr.bf16.mxu0 %v726_v0  ;;  %559 = vmatprep.subr.bf16.mxu1 %v726_v0  ;;  %v634_v13 = vld [vmem:[#allocation5] sm:$0xff]   ;;  %v635_v14 = vld [vmem:[#allocation5 + $0x8] sm:$0xff]   ;;  %v636_v15 = vld [vmem:[#allocation5 + $0x10] sm:$0xff]  }
  0x2b   :  { %v637_v16 = vld [vmem:[#allocation5 + $0x18] sm:$0xff]   ;;  %v638_v17 = vld [vmem:[#allocation5 + $0x20] sm:$0xff]   ;;  %v639_v18 = vld [vmem:[#allocation5 + $0x28] sm:$0xff]  }
  0x2c   :  { %v488_v19 = vld [vmem:[%s914_s2] ss:$0 sm:$0xff]  ;;  %v641_v28 = vld [vmem:[#allocation5 + $0x38] sm:$0xff]   ;;  %v644_v31 = vld [vmem:[%s919_s7 + $0x10] sm:$0xff]  }
  0x2d   :  { %552 = vmatpush3.bf16.msra.mxu0 %v625_v2  ;;  %560 = vmatpush3.bf16.msra.mxu1 %v627_v6  ;;  %v640_v27 = vld [vmem:[#allocation5 + $0x30] sm:$0xff]   ;;  %v643_v30 = vld [vmem:[%s919_s7 + $0x8] sm:$0xff]   ;;  %v645_v32 = vld [vmem:[%s919_s7 + $0x18] sm:$0xff]  }
  0x2e   :  { %577 = vmatprep.subr.bf16.mxu0 %v726_v0  ;;  %561 = vmatprep.subr.bf16.mxu1 %v726_v0  ;;  %v642_v29 = vld [vmem:[%s919_s7] sm:$0xff]   ;;  %v647_v34 = vld [vmem:[%s919_s7 + $0x28] sm:$0xff]   ;;  %v648_v43 = vld [vmem:[%s919_s7 + $0x30] sm:$0xff]  }
  0x2f   :  { %v646_v33 = vld [vmem:[%s919_s7 + $0x20] sm:$0xff]   ;;  %v649_v44 = vld [vmem:[%s919_s7 + $0x38] sm:$0xff]  }
  0x30   :  { %554 = vmatmul.mubr.msk.bf16.vlgmr.msra.gmra.mrb[0].mxu0 %vm87_vm1, %v68_v5  ;;  %v492_v35 = vld [vmem:[%s916_s4] ss:$0 sm:$0xff] }
  0x31   :  { %593 = vmatprep.mubr.msk.bf16.mxu0 %vm727_vm0, %v726_v0  ;;  %562 = vmatpush3.bf16.msra.mxu1 %v628_v7  ;;  %v501_v45 = vld [vmem:[%s918_s6] ss:$0 sm:$0xff]  ;;  %s694_s6 = scalar_lea.vmem %s479_s27, 128 }
  0x32   :  { %563 = vmatprep.subr.bf16.mxu1 %v726_v0  ;;  %578 = vmatpush3.bf16.msra.mxu0 %v634_v13  ;;  %v510_v53 = vld [vmem:[%s920_s8] ss:$0 sm:$0xff]  ;;  %p695_p2 = scmp.ne.s32.totalorder %s479_s27, %s694_s6  ;;  %p700_p4 = scmp.lt.s32.totalorder %s694_s6, %s694_s6 }
  0x33   :  { %579 = vmatprep.subr.bf16.mxu0 %v726_v0 }
  0x34   :  { %p701_p5 = por %p700_p4, %p699_p3 }
  0x35   :  { %564 = vmatpush3.bf16.msra.mxu1 %v629_v8 }
  0x36   :  { %565 = vmatprep.subr.bf16.mxu1 %v726_v0  ;;  %580 = vmatpush3.bf16.msra.mxu0 %v635_v14  ;;  %p702_p6 = pnand %p701_p5, %p695_p2 }
  0x37   :  { %581 = vmatprep.subr.bf16.mxu0 %v726_v0 }
  0x39   :  { %566 = vmatpush3.bf16.msra.mxu1 %v630_v9 }
  0x3a   :  { %567 = vmatprep.subr.bf16.mxu1 %v726_v0  ;;  %582 = vmatpush3.bf16.msra.mxu0 %v636_v15 }
  0x3b   :  { %583 = vmatprep.subr.bf16.mxu0 %v726_v0 }
  0x3d   :  { %568 = vmatpush3.bf16.msra.mxu1 %v631_v10 }
  0x3e   :  { %569 = vmatprep.subr.bf16.mxu1 %v726_v0  ;;  %584 = vmatpush3.bf16.msra.mxu0 %v637_v16 }
  0x3f   :  { %585 = vmatprep.subr.bf16.mxu0 %v726_v0 }
  0x41   :  { %570 = vmatpush3.bf16.msra.mxu1 %v632_v11 }
  0x42   :  { %571 = vmatprep.subr.bf16.mxu1 %v726_v0  ;;  %586 = vmatpush3.bf16.msra.mxu0 %v638_v17 }
  0x43   :  { %587 = vmatprep.subr.bf16.mxu0 %v726_v0 }
  0x45   :  { %572 = vmatpush3.bf16.msra.mxu1 %v633_v12 }
  0x46   :  { %597 = vmatprep.subr.bf16.mxu1 %v726_v0  ;;  %588 = vmatpush3.bf16.msra.mxu0 %v639_v18 }
  0x47   :  { %589 = vmatprep.subr.bf16.mxu0 %v726_v0 }
  0x4a   :  { %590 = vmatpush3.bf16.msra.mxu0 %v640_v27 }
  0x4b   :  { %591 = vmatprep.subr.bf16.mxu0 %v726_v0 }
  0x4e   :  { %592 = vmatpush3.bf16.msra.mxu0 %v641_v28 }
 0x103   :  { %v125_v20 = vpop.f32.mrb[0].mxu0 }
 0x104   :  { %v126_v21 = vadd.f32 %v488_v19, %v125_v20  ;;  %v555_v22 = vpop.f32.mrb[1].mxu0 }
 0x105   :  { %v128_v23 = vpop.f32.mrb[2].mxu0 }
 0x106   :  { %v131_v24 = vmax.f32 %v126_v21, 0.0  ;;  %v556_v25 = vpop.f32.mrb[3].mxu0 }
 0x108   :  { %v149_v26 = vpack.c.bf16 %v131_v24, %v131_v24 }
 0x10a   :  { %574 = vmatmul.mubr.bf16.vlgmr.msra.gmra.mrb[0].mxu1 %v149_v26 }
 0x10b   :  { %613 = vmatprep.mubr.msk.bf16.mxu1 %vm727_vm0, %v726_v0  ;;  %598 = vmatpush3.bf16.msra.mxu1 %v642_v29 }
 0x10c   :  { %599 = vmatprep.subr.bf16.mxu1 %v726_v0 }
 0x10f   :  { %600 = vmatpush3.bf16.msra.mxu1 %v643_v30 }
 0x110   :  { %601 = vmatprep.subr.bf16.mxu1 %v726_v0 }
 0x113   :  { %602 = vmatpush3.bf16.msra.mxu1 %v644_v31 }
 0x114   :  { %603 = vmatprep.subr.bf16.mxu1 %v726_v0 }
 0x117   :  { %604 = vmatpush3.bf16.msra.mxu1 %v645_v32 }
 0x118   :  { %605 = vmatprep.subr.bf16.mxu1 %v726_v0 }
 0x11b   :  { %606 = vmatpush3.bf16.msra.mxu1 %v646_v33 }
 0x11c   :  { %607 = vmatprep.subr.bf16.mxu1 %v726_v0 }
 0x11f   :  { %608 = vmatpush3.bf16.msra.mxu1 %v647_v34 }
 0x120   :  { %609 = vmatprep.subr.bf16.mxu1 %v726_v0 }
 0x123   :  { %610 = vmatpush3.bf16.msra.mxu1 %v648_v43 }
 0x124   :  { %611 = vmatprep.subr.bf16.mxu1 %v726_v0 }
 0x127   :  { %612 = vmatpush3.bf16.msra.mxu1 %v649_v44 }
 0x1dd   :  { %v238_v36 = vpop.f32.mrb[0].mxu1 }
 0x1de   :  { %v239_v37 = vadd.f32 %v492_v35, %v238_v36  ;;  %v575_v38 = vpop.f32.mrb[1].mxu1 }
 0x1df   :  { %v241_v39 = vpop.f32.mrb[2].mxu1 }
 0x1e0   :  { %v244_v40 = vmax.f32 %v239_v37, 0.0  ;;  %v576_v41 = vpop.f32.mrb[3].mxu1 }
 0x1e2   :  { %v262_v42 = vpack.c.bf16 %v244_v40, %v244_v40 }
 0x1e4   :  { %594 = vmatmul.mubr.bf16.vlgmr.msra.gmra.mrb[4].mxu0 %v262_v42 }
 0x2b7   :  { %v351_v46 = vpop.f32.mrb[4].mxu0 }
 0x2b8   :  { %v352_v47 = vadd.f32 %v501_v45, %v351_v46  ;;  %v595_v48 = vpop.f32.mrb[5].mxu0 }
 0x2b9   :  { %v354_v49 = vpop.f32.mrb[6].mxu0 }
 0x2ba   :  { %v357_v50 = vmax.f32 %v352_v47, 0.0  ;;  %v596_v51 = vpop.f32.mrb[7].mxu0 }
 0x2bc   :  { %v375_v52 = vpack.c.bf16 %v357_v50, %v357_v50 }
 0x2be   :  { %614 = vmatmul.mubr.bf16.vlgmr.msra.gmra.mrb[4].mxu1 %v375_v52 }
 0x391   :  { %v464_v54 = vpop.f32.mrb[4].mxu1 }
 0x392   :  { %v465_v55 = vadd.f32 %v510_v53, %v464_v54  ;;  %v615_v56 = vpop.f32.mrb[5].mxu1 }
 0x393   :  { %v467_v57 = vpop.f32.mrb[6].mxu1 }
 0x394   :  { %v616_v58 = vpop.f32.mrb[7].mxu1  ;;  %471 = vst.msk [vmem:[#allocation7] sm:$0xff] %vm470_vm2, %v465_v55 }
 0x395   :  { %705 = shalt.err (!%p702_p6)
}
 0x396   :  { %s706_s8 = scalar_lea.hbm %s921_s9, 128 }
 0x397   :  { %p707_p7 = scmp.ne.s32.totalorder %s921_s9, %s706_s8  ;;  %p710_p8 = scmp.lt.u32.totalorder %s706_s8, %s921_s9 }
 0x399   :  { %p712_p9 = pnand %p710_p8, %p707_p7 }
 0x39b   :  { %715 = shalt.err (!%p712_p9)
}
 0x39c   :  { %481 = dma.vmem_to_hbm [thread:$0]  %s479_s27, 128, %s921_s9, [#allocation4]  }
 0x39d   :  { %720 = dma.done.wait [#allocation4], 128  }
 0x39e   :  { %721 = vsyncadd [#allocation4], 4294967168 }
 0x39f   :  { %485 = vsyncpa [#allocation3], 1 }
 0x3a0   :  { %486 = vsyncpa [#allocation6], 1 }
 0x3a1   :  { %487 = vsyncpa [#allocation4], 1 }

// kernel: tpu_custom_call.1
= control target key start
LH: loop header
LB: loop body
LE: loop exit
PB: predicated region body
PF: predicated region fallthrough
CT: control target
= control target key end

     0   :  { %14 = vsyncpa [#allocation3], 0  ;;  %s912_s0 = inlined_call_operand.vmem [shape: f32[8,32], index: 0, kind: input, shape index: {}]   ;;  %s913_s1 = inlined_call_operand.hbm [shape: bf16[32,128], index: 1, kind: input, shape index: {}]   ;;  %s914_s2 = inlined_call_operand.vmem [shape: f32[1,128], index: 2, kind: input, shape index: {}]   ;;  %s915_s3 = inlined_call_operand.vmem [shape: bf16[128,128], index: 3, kind: input, shape index: {}]   ;;  %s916_s4 = inlined_call_operand.vmem [shape: f32[1,128], index: 4, kind: input, shape index: {}]   ;;  %s917_s5 = inlined_call_operand.hbm [shape: bf16[128,128], index: 5, kind: input, shape index: {}]   ;;  %s918_s6 = inlined_call_operand.vmem [shape: f32[1,128], index: 6, kind: input, shape index: {}]   ;;  %s919_s7 = inlined_call_operand.vmem [shape: bf16[128,8], index: 7, kind: input, shape index: {}]   ;;  %s920_s8 = inlined_call_operand.vmem [shape: f32[1,8], index: 8, kind: input, shape index: {}]   ;;  %s921_s9 = inlined_call_operand.hbm [shape: f32[8,8], index: 9, kind: output, shape index: {}]  }
   0x1   :  { %15 = vsyncpa [#allocation6], 0 }
   0x2   :  { %16 = vsyncpa [#allocation4], 0  ;;  %s722_s30 = smov [#allocation2]   ;;  %s650_s13 = scalar_lea.hbm %s913_s1, 256 }
   0x3   :  { %s24_s10 = sshll.u32 %s722_s30, 4  ;;  %p651_p0 = scmp.ne.s32.totalorder %s913_s1, %s650_s13  ;;  %s25_s10 = int_to_ptr.vmem [resolvable:$true] %s24_s10 }
   0x4   :  { %p654_p1 = scmp.lt.u32.totalorder %s650_s13, %s913_s1 }
   0x6   :  { %p656_p2 = pnand %p654_p1, %p651_p0 }
   0x8   :  { %659 = shalt.err (!%p656_p2)
}
   0x9   :  { %s660_s18 = scalar_lea.vmem %s25_s10, 256  ;;  %p665_p4 = scmp.lt.s32.totalorder %s25_s10, %s25_s10 }
   0xa   :  { %p661_p3 = scmp.ne.s32.totalorder %s25_s10, %s660_s18  ;;  %p666_p5 = scmp.lt.s32.totalorder %s660_s18, %s660_s18 }
   0xc   :  { %p667_p6 = por %p666_p5, %p665_p4 }
   0xe   :  { %p668_p7 = pnand %p667_p6, %p661_p3 }
  0x10   :  { %671 = shalt.err (!%p668_p7)
}
  0x11   :  { %s723_s19 = smov 64   ;;  %s724_s20 = smov 4  }
  0x12   :  { %30 = dma.hbm_to_vmem [thread:$0]  %s913_s1, 256, %s25_s10, [#allocation3], %s723_s19, %s723_s19, %s724_s20  }
  0x13   :  { %s725_s23 = smov [#allocation5]   ;;  %s672_s27 = scalar_lea.hbm %s917_s5, 1024 }
  0x14   :  { %s42_s24 = sshll.u32 %s725_s23, 4  ;;  %p673_p8 = scmp.ne.s32.totalorder %s917_s5, %s672_s27  ;;  %s43_s24 = int_to_ptr.vmem [resolvable:$true] %s42_s24 }
  0x15   :  { %p676_p9 = scmp.lt.u32.totalorder %s672_s27, %s917_s5 }
  0x17   :  { %p678_p10 = pnand %p676_p9, %p673_p8 }
  0x19   :  { %681 = shalt.err (!%p678_p10)
}
  0x1a   :  { %s682_s12 = scalar_lea.vmem %s43_s24, 1024  ;;  %p687_p12 = scmp.lt.s32.totalorder %s43_s24, %s43_s24 }
  0x1b   :  { %p683_p11 = scmp.ne.s32.totalorder %s43_s24, %s682_s12  ;;  %p688_p13 = scmp.lt.s32.totalorder %s682_s12, %s682_s12 }
  0x1d   :  { %p689_p0 = por %p688_p13, %p687_p12 }
  0x1f   :  { %p690_p1 = pnand %p689_p0, %p683_p11 }
  0x21   :  { %693 = shalt.err (!%p690_p1)
}
  0x22   :  { %48 = dma.hbm_to_vmem [thread:$0]  %s917_s5, 1024, %s43_s24, [#allocation6], %s723_s19, %s723_s19, %s724_s20  }
  0x23   :  { %716 = dma.done.wait [#allocation3], 256  }
  0x24   :  { %717 = vsyncadd [#allocation3], 4294967040 }
  0x25   :  { %718 = dma.done.wait [#allocation6], 1024  }
  0x26   :  { %719 = vsyncadd [#allocation6], 4294966272  ;;  %v726_v0 = vmov 0.0   ;;  %vm727_vm0 = vmmov 0   ;;  %v624_v1 = vld [vmem:[#allocation2] sm:$0xff]   ;;  %v625_v2 = vld [vmem:[#allocation2 + $0x8] sm:$0xff]  }
  0x27   :  { %549 = vmatprep.subr.bf16.mxu0 %v726_v0  ;;  %553 = vmatprep.mubr.msk.bf16.mxu0 %vm727_vm0, %v726_v0  ;;  %v62_v3 = vld [vmem:[%s912_s0] sm:$0xff]  ;;  %v627_v6 = vld [vmem:[%s915_s3 + $0x8] sm:$0xff]   ;;  %vm87_vm1 = vcmask 261120   ;;  %v628_v7 = vld [vmem:[%s915_s3 + $0x10] sm:$0xff]   ;;  %s728_s26 = smov [#allocation7]   ;;  %vm470_vm2 = vcmask 64512  }
  0x28   :  { %557 = vmatprep.subr.bf16.mxu1 %v726_v0  ;;  %573 = vmatprep.mubr.msk.bf16.mxu1 %vm727_vm0, %v726_v0  ;;  %v626_v4 = vld [vmem:[%s915_s3] sm:$0xff]   ;;  %v68_v5 = vpack.c.bf16 %v62_v3, %v62_v3  ;;  %v629_v8 = vld [vmem:[%s915_s3 + $0x18] sm:$0xff]   ;;  %v631_v10 = vld [vmem:[%s915_s3 + $0x28] sm:$0xff]   ;;  %s478_s27 = sshll.u32 %s728_s26, 4  ;;  %s479_s27 = int_to_ptr.vmem [resolvable:$true] %s478_s27 }
  0x29   :  { %550 = vmatpush3.bf16.msra.mxu0 %v624_v1  ;;  %558 = vmatpush3.bf16.msra.mxu1 %v626_v4  ;;  %v630_v9 = vld [vmem:[%s915_s3 + $0x20] sm:$0xff]   ;;  %v632_v11 = vld [vmem:[%s915_s3 + $0x30] sm:$0xff]   ;;  %v633_v12 = vld [vmem:[%s915_s3 + $0x38] sm:$0xff]   ;;  %p699_p3 = scmp.lt.s32.totalorder %s479_s27, %s479_s27 }
  0x2a   :  { %551 = vmatprep.subr.bf16.mxu0 %v726_v0  ;;  %559 = vmatprep.subr.bf16.mxu1 %v726_v0  ;;  %v634_v13 = vld [vmem:[#allocation5] sm:$0xff]   ;;  %v635_v14 = vld [vmem:[#allocation5 + $0x8] sm:$0xff]   ;;  %v636_v15 = vld [vmem:[#allocation5 + $0x10] sm:$0xff]  }
  0x2b   :  { %v637_v16 = vld [vmem:[#allocation5 + $0x18] sm:$0xff]   ;;  %v638_v17 = vld [vmem:[#allocation5 + $0x20] sm:$0xff]   ;;  %v639_v18 = vld [vmem:[#allocation5 + $0x28] sm:$0xff]  }
  0x2c   :  { %v488_v19 = vld [vmem:[%s914_s2] ss:$0 sm:$0xff]  ;;  %v641_v28 = vld [vmem:[#allocation5 + $0x38] sm:$0xff]   ;;  %v644_v31 = vld [vmem:[%s919_s7 + $0x10] sm:$0xff]  }
  0x2d   :  { %552 = vmatpush3.bf16.msra.mxu0 %v625_v2  ;;  %560 = vmatpush3.bf16.msra.mxu1 %v627_v6  ;;  %v640_v27 = vld [vmem:[#allocation5 + $0x30] sm:$0xff]   ;;  %v643_v30 = vld [vmem:[%s919_s7 + $0x8] sm:$0xff]   ;;  %v645_v32 = vld [vmem:[%s919_s7 + $0x18] sm:$0xff]  }
  0x2e   :  { %577 = vmatprep.subr.bf16.mxu0 %v726_v0  ;;  %561 = vmatprep.subr.bf16.mxu1 %v726_v0  ;;  %v642_v29 = vld [vmem:[%s919_s7] sm:$0xff]   ;;  %v647_v34 = vld [vmem:[%s919_s7 + $0x28] sm:$0xff]   ;;  %v648_v43 = vld [vmem:[%s919_s7 + $0x30] sm:$0xff]  }
  0x2f   :  { %v646_v33 = vld [vmem:[%s919_s7 + $0x20] sm:$0xff]   ;;  %v649_v44 = vld [vmem:[%s919_s7 + $0x38] sm:$0xff]  }
  0x30   :  { %554 = vmatmul.mubr.msk.bf16.vlgmr.msra.gmra.mrb[0].mxu0 %vm87_vm1, %v68_v5  ;;  %v492_v35 = vld [vmem:[%s916_s4] ss:$0 sm:$0xff] }
  0x31   :  { %593 = vmatprep.mubr.msk.bf16.mxu0 %vm727_vm0, %v726_v0  ;;  %562 = vmatpush3.bf16.msra.mxu1 %v628_v7  ;;  %v501_v45 = vld [vmem:[%s918_s6] ss:$0 sm:$0xff]  ;;  %s694_s6 = scalar_lea.vmem %s479_s27, 128 }
  0x32   :  { %563 = vmatprep.subr.bf16.mxu1 %v726_v0  ;;  %578 = vmatpush3.bf16.msra.mxu0 %v634_v13  ;;  %v510_v53 = vld [vmem:[%s920_s8] ss:$0 sm:$0xff]  ;;  %p695_p2 = scmp.ne.s32.totalorder %s479_s27, %s694_s6  ;;  %p700_p4 = scmp.lt.s32.totalorder %s694_s6, %s694_s6 }
  0x33   :  { %579 = vmatprep.subr.bf16.mxu0 %v726_v0 }
  0x34   :  { %p701_p5 = por %p700_p4, %p699_p3 }
  0x35   :  { %564 = vmatpush3.bf16.msra.mxu1 %v629_v8 }
  0x36   :  { %565 = vmatprep.subr.bf16.mxu1 %v726_v0  ;;  %580 = vmatpush3.bf16.msra.mxu0 %v635_v14  ;;  %p702_p6 = pnand %p701_p5, %p695_p2 }
  0x37   :  { %581 = vmatprep.subr.bf16.mxu0 %v726_v0 }
  0x39   :  { %566 = vmatpush3.bf16.msra.mxu1 %v630_v9 }
  0x3a   :  { %567 = vmatprep.subr.bf16.mxu1 %v726_v0  ;;  %582 = vmatpush3.bf16.msra.mxu0 %v636_v15 }
  0x3b   :  { %583 = vmatprep.subr.bf16.mxu0 %v726_v0 }
  0x3d   :  { %568 = vmatpush3.bf16.msra.mxu1 %v631_v10 }
  0x3e   :  { %569 = vmatprep.subr.bf16.mxu1 %v726_v0  ;;  %584 = vmatpush3.bf16.msra.mxu0 %v637_v16 }
  0x3f   :  { %585 = vmatprep.subr.bf16.mxu0 %v726_v0 }
  0x41   :  { %570 = vmatpush3.bf16.msra.mxu1 %v632_v11 }
  0x42   :  { %571 = vmatprep.subr.bf16.mxu1 %v726_v0  ;;  %586 = vmatpush3.bf16.msra.mxu0 %v638_v17 }
  0x43   :  { %587 = vmatprep.subr.bf16.mxu0 %v726_v0 }
  0x45   :  { %572 = vmatpush3.bf16.msra.mxu1 %v633_v12 }
  0x46   :  { %597 = vmatprep.subr.bf16.mxu1 %v726_v0  ;;  %588 = vmatpush3.bf16.msra.mxu0 %v639_v18 }
  0x47   :  { %589 = vmatprep.subr.bf16.mxu0 %v726_v0 }
  0x4a   :  { %590 = vmatpush3.bf16.msra.mxu0 %v640_v27 }
  0x4b   :  { %591 = vmatprep.subr.bf16.mxu0 %v726_v0 }
  0x4e   :  { %592 = vmatpush3.bf16.msra.mxu0 %v641_v28 }
 0x103   :  { %v125_v20 = vpop.f32.mrb[0].mxu0 }
 0x104   :  { %v126_v21 = vadd.f32 %v488_v19, %v125_v20  ;;  %v555_v22 = vpop.f32.mrb[1].mxu0 }
 0x105   :  { %v128_v23 = vpop.f32.mrb[2].mxu0 }
 0x106   :  { %v131_v24 = vmax.f32 %v126_v21, 0.0  ;;  %v556_v25 = vpop.f32.mrb[3].mxu0 }
 0x108   :  { %v149_v26 = vpack.c.bf16 %v131_v24, %v131_v24 }
 0x10a   :  { %574 = vmatmul.mubr.bf16.vlgmr.msra.gmra.mrb[0].mxu1 %v149_v26 }
 0x10b   :  { %613 = vmatprep.mubr.msk.bf16.mxu1 %vm727_vm0, %v726_v0  ;;  %598 = vmatpush3.bf16.msra.mxu1 %v642_v29 }
 0x10c   :  { %599 = vmatprep.subr.bf16.mxu1 %v726_v0 }
 0x10f   :  { %600 = vmatpush3.bf16.msra.mxu1 %v643_v30 }
 0x110   :  { %601 = vmatprep.subr.bf16.mxu1 %v726_v0 }
 0x113   :  { %602 = vmatpush3.bf16.msra.mxu1 %v644_v31 }
 0x114   :  { %603 = vmatprep.subr.bf16.mxu1 %v726_v0 }
 0x117   :  { %604 = vmatpush3.bf16.msra.mxu1 %v645_v32 }
 0x118   :  { %605 = vmatprep.subr.bf16.mxu1 %v726_v0 }
 0x11b   :  { %606 = vmatpush3.bf16.msra.mxu1 %v646_v33 }
 0x11c   :  { %607 = vmatprep.subr.bf16.mxu1 %v726_v0 }
 0x11f   :  { %608 = vmatpush3.bf16.msra.mxu1 %v647_v34 }
 0x120   :  { %609 = vmatprep.subr.bf16.mxu1 %v726_v0 }
 0x123   :  { %610 = vmatpush3.bf16.msra.mxu1 %v648_v43 }
 0x124   :  { %611 = vmatprep.subr.bf16.mxu1 %v726_v0 }
 0x127   :  { %612 = vmatpush3.bf16.msra.mxu1 %v649_v44 }
 0x1dd   :  { %v238_v36 = vpop.f32.mrb[0].mxu1 }
 0x1de   :  { %v239_v37 = vadd.f32 %v492_v35, %v238_v36  ;;  %v575_v38 = vpop.f32.mrb[1].mxu1 }
 0x1df   :  { %v241_v39 = vpop.f32.mrb[2].mxu1 }
 0x1e0   :  { %v244_v40 = vmax.f32 %v239_v37, 0.0  ;;  %v576_v41 = vpop.f32.mrb[3].mxu1 }
 0x1e2   :  { %v262_v42 = vpack.c.bf16 %v244_v40, %v244_v40 }
 0x1e4   :  { %594 = vmatmul.mubr.bf16.vlgmr.msra.gmra.mrb[4].mxu0 %v262_v42 }
 0x2b7   :  { %v351_v46 = vpop.f32.mrb[4].mxu0 }
 0x2b8   :  { %v352_v47 = vadd.f32 %v501_v45, %v351_v46  ;;  %v595_v48 = vpop.f32.mrb[5].mxu0 }
 0x2b9   :  { %v354_v49 = vpop.f32.mrb[6].mxu0 }
 0x2ba   :  { %v357_v50 = vmax.f32 %v352_v47, 0.0  ;;  %v596_v51 = vpop.f32.mrb[7].mxu0 }
 0x2bc   :  { %v375_v52 = vpack.c.bf16 %v357_v50, %v357_v50 }
 0x2be   :  { %614 = vmatmul.mubr.bf16.vlgmr.msra.gmra.mrb[4].mxu1 %v375_v52 }
 0x391   :  { %v464_v54 = vpop.f32.mrb[4].mxu1 }
 0x392   :  { %v465_v55 = vadd.f32 %v510_v53, %v464_v54  ;;  %v615_v56 = vpop.f32.mrb[5].mxu1 }
 0x393   :  { %v467_v57 = vpop.f32.mrb[6].mxu1 }
 0x394   :  { %v616_v58 = vpop.f32.mrb[7].mxu1  ;;  %471 = vst.msk [vmem:[#allocation7] sm:$0xff] %vm470_vm2, %v465_v55 }
 0x395   :  { %705 = shalt.err (!%p702_p6)
}
 0x396   :  { %s706_s8 = scalar_lea.hbm %s921_s9, 128 }
 0x397   :  { %p707_p7 = scmp.ne.s32.totalorder %s921_s9, %s706_s8  ;;  %p710_p8 = scmp.lt.u32.totalorder %s706_s8, %s921_s9 }
 0x399   :  { %p712_p9 = pnand %p710_p8, %p707_p7 }
 0x39b   :  { %715 = shalt.err (!%p712_p9)
}
 0x39c   :  { %481 = dma.vmem_to_hbm [thread:$0]  %s479_s27, 128, %s921_s9, [#allocation4]  }
 0x39d   :  { %720 = dma.done.wait [#allocation4], 128  }
 0x39e   :  { %721 = vsyncadd [#allocation4], 4294967168 }
 0x39f   :  { %485 = vsyncpa [#allocation3], 1 }
 0x3a0   :  { %486 = vsyncpa [#allocation6], 1 }
 0x3a1   :  { %487 = vsyncpa [#allocation4], 1 }

</bundles_post_ra>
